<compile_context>
chip_gen: v6e
topology: v6e:2x2x1
jax: 0.10.0
libtpu: 0.0.40
codegen_flags: <defaults>
</compile_context>

<pallas_src>
import functools

import jax
import jax.numpy as jnp
import numpy as np
from jax.experimental import pallas as pl
from jax.experimental.pallas import tpu as pltpu


def _round_up(n, m):
    return ((n + m - 1) // m) * m


def _cdiv(a, b):
    return -(-a // b)


# ----------------------------------------------------------------------------
# Kernel A: complex channel mixing in Fourier space (corners folded on lanes)
#   out[b, o, m] = sum_i x[b, i, m] * w[i, o, m]      (complex, split re/im)
#   m = flattened (top-corner ++ bottom-corner) mode axis, zero-padded to 128k.
# ----------------------------------------------------------------------------
def _make_spectral_mix_kernel(cin):
    def kernel(xr_ref, xi_ref, wr_ref, wi_ref, or_ref, oi_ref):
        acc_r = jnp.zeros(or_ref.shape, jnp.float32)   # (B, Cp_out, MT)
        acc_i = jnp.zeros(oi_ref.shape, jnp.float32)

        if cin <= 8:
            # Static unroll: only one x-row + one w-slab live besides the accs.
            for i in range(cin):
                xr_i = xr_ref[:, i:i + 1, :]           # (B, 1, MT)
                xi_i = xi_ref[:, i:i + 1, :]
                wr_i = wr_ref[i:i + 1, :, :]           # (1, Cp_out, MT)
                wi_i = wi_ref[i:i + 1, :, :]
                acc_r = acc_r + (xr_i * wr_i - xi_i * wi_i)
                acc_i = acc_i + (xr_i * wi_i + xi_i * wr_i)
        else:
            # Large Cin: keep vreg pressure bounded with a rolled loop.
            def body(i, carry):
                ar, ai = carry
                xr_i = xr_ref[:, pl.ds(i, 1), :]
                xi_i = xi_ref[:, pl.ds(i, 1), :]
                wr_i = wr_ref[pl.ds(i, 1), :, :]
                wi_i = wi_ref[pl.ds(i, 1), :, :]
                ar = ar + (xr_i * wr_i - xi_i * wi_i)
                ai = ai + (xr_i * wi_i + xi_i * wr_i)
                return ar, ai

            acc_r, acc_i = jax.lax.fori_loop(0, cin, body, (acc_r, acc_i))

        or_ref[...] = acc_r
        oi_ref[...] = acc_i

    return kernel


def _mode_tile(mp, prefer_steps=4):
    """Pick a mode tile dividing mp; prefer >=4 grid steps (v7x megacore)."""
    for t in (512, 256, 128):
        if mp % t == 0 and mp // t >= prefer_steps:
            return t
    for t in (512, 256, 128):
        if mp % t == 0:
            return t
    return mp


def spectral_mix(xr, xi, wr, wi):
    """xr/xi: (B, Cin, Mp); wr/wi: (Cin, Cp_out, Mp) -> two (B, Cp_out, Mp)."""
    B, Cin, Mp = xr.shape
    Cp_out = wr.shape[1]
    mt = _mode_tile(Mp)
    grid = (Mp // mt,)

    x_spec = pl.BlockSpec((B, Cin, mt), lambda j: (0, 0, j))
    w_spec = pl.BlockSpec((Cin, Cp_out, mt), lambda j: (0, 0, j))
    o_spec = pl.BlockSpec((B, Cp_out, mt), lambda j: (0, 0, j))

    block_bytes = 4 * mt * (2 * B * Cin + 2 * Cin * Cp_out + 2 * B * Cp_out)
    vmem = min(max(2 * block_bytes + (8 << 20), 32 << 20), 48 << 20)

    return pl.pallas_call(
        _make_spectral_mix_kernel(Cin),
        out_shape=[jax.ShapeDtypeStruct((B, Cp_out, Mp), jnp.float32),
                   jax.ShapeDtypeStruct((B, Cp_out, Mp), jnp.float32)],
        grid=grid,
        in_specs=[x_spec, x_spec, w_spec, w_spec],
        out_specs=[o_spec, o_spec],
        compiler_params=pltpu.CompilerParams(
            dimension_semantics=("parallel",),
            vmem_limit_bytes=vmem),
    )(xr, xi, wr, wi)


# ----------------------------------------------------------------------------
# Kernel B: fused physical-space path, native (B, C, HW) layout
#   out[b] = tanh( spec[b] + W @ x[b] + bias )
#   Small channel counts -> VPU FMAs; large -> MXU matmul.
# ----------------------------------------------------------------------------
def _make_fuse_kernel(cin, use_mxu):
    def kernel(spec_ref, x_ref, w_ref, b_ref, o_ref):
        spec = spec_ref[...]                           # (Cout, LT)
        x = x_ref[...]                                 # (Cin, LT)
        if use_mxu:
            lin = jnp.dot(w_ref[...], x, preferred_element_type=jnp.float32)
        else:
            w = w_ref[...]                             # (Cout, Cin), tiny
            lin = w[:, 0:1] * x[0:1, :]
            for i in range(1, cin):
                lin = lin + w[:, i:i + 1] * x[i:i + 1, :]
        o_ref[...] = jnp.tanh(spec + b_ref[...] + lin)

    return kernel


_LANE_CANDIDATES = (8192, 4096, 2048, 1024, 512, 256, 128)


def _pick_lane_tile(hw, batch, min_total_steps=4):
    """Largest lane tile that still yields >= min_total_steps parallel grid
    steps (batch axis included) so both v7x TensorCores stay pipelined."""
    for t in _LANE_CANDIDATES:
        if t <= hw and batch * _cdiv(hw, t) >= min_total_steps:
            return t
    for t in _LANE_CANDIDATES:
        if t <= hw:
            return t
    return max(hw, 1)                                  # hw < 128: full-dim block


def fused_conv_add_tanh(spec, x, w, b):
    """spec: (B,Cout,HW); x: (B,Cin,HW); w: (Cout,Cin); b: (Cout,1) -> (B,Cout,HW)."""
    B, Cout, HW = spec.shape
    Cin = x.shape[1]

    lt = _pick_lane_tile(HW, B)
    # v7x VMEM budget: (spec + x + out blocks) x 2 buffers + weights <= ~48 MiB.
    while lt > 128 and 2 * (4 * lt * (2 * Cout + Cin)) > (40 << 20):
        lt //= 2
    block_bytes = 4 * lt * (2 * Cout + Cin) + 4 * Cout * (Cin + 1)
    vmem = min(max(2 * block_bytes + (8 << 20), 32 << 20), 48 << 20)

    grid = (B, _cdiv(HW, lt))                          # cdiv: no divisibility cliff
    use_mxu = min(Cin, Cout) >= 32

    return pl.pallas_call(
        _make_fuse_kernel(Cin, use_mxu),
        out_shape=jax.ShapeDtypeStruct((B, Cout, HW), jnp.float32),
        grid=grid,
        in_specs=[pl.BlockSpec((None, Cout, lt), lambda bi, j: (bi, 0, j)),
                  pl.BlockSpec((None, Cin, lt), lambda bi, j: (bi, 0, j)),
                  pl.BlockSpec((Cout, Cin), lambda bi, j: (0, 0)),
                  pl.BlockSpec((Cout, 1), lambda bi, j: (0, 0))],
        out_specs=pl.BlockSpec((None, Cout, lt), lambda bi, j: (bi, 0, j)),
        compiler_params=pltpu.CompilerParams(
            dimension_semantics=("parallel", "parallel"),
            vmem_limit_bytes=vmem),
    )(spec, x, w, b)


# ----------------------------------------------------------------------------
# One-time weight preparation (hoisted out of the per-call forward)
# ----------------------------------------------------------------------------
def prepare_params(w1r, w1i, w2r, w2i, cw, cb, n_modes):
    """Fold both frequency corners onto one lane-dense mode axis (padded to a
    multiple of 128) and pad Cout to a multiple of 8 sublanes."""
    Cin, Cout, m1, m2 = w1r.shape
    assert (m1, m2) == tuple(n_modes)
    M = m1 * m2
    Mp = _round_up(2 * M, 128)
    Cp_out = _round_up(Cout, 8)

    def fold(wa, wb):
        w = jnp.concatenate([wa.reshape(Cin, Cout, M).astype(jnp.float32),
                             wb.reshape(Cin, Cout, M).astype(jnp.float32)],
                            axis=-1)                    # (Cin, Cout, 2M)
        return jnp.pad(w, ((0, 0), (0, Cp_out - Cout), (0, Mp - 2 * M)))

    return dict(wr=fold(w1r, w2r), wi=fold(w1i, w2i),
                cw=cw.astype(jnp.float32),
                cb=cb.astype(jnp.float32).reshape(Cout, 1),
                n_modes=(m1, m2), out_channels=Cout)


# ----------------------------------------------------------------------------
# FourierBlock2D forward
# ----------------------------------------------------------------------------
@functools.partial(jax.jit, static_argnames=("n_modes", "out_channels"))
def fourier_block_2d(x, wr, wi, cw, cb, *, n_modes, out_channels):
    """x: (B, Cin, Nx, Ny) float32 -> (B, Cout, Nx, Ny) float32."""
    B, Cin, Nx, Ny = x.shape
    Cout = out_channels
    m1, m2 = n_modes
    Nyf = Ny // 2 + 1
    M = m1 * m2
    Mp = wr.shape[-1]
    # pad+concat assembly of out_ft requires non-overlapping corners
    assert Nx >= 2 * m1 and m2 <= Nyf, "n_modes too large for this grid"

    # ---- spectral path: FFT in XLA, channel mixing in Pallas ---------------
    # TODO(synk): rfft2 / irfft2 have no Pallas/Mosaic primitive; kept in XLA.
    x_ft = jnp.fft.rfft2(x)                                  # (B, Cin, Nx, Nyf)
    corners = jnp.concatenate(
        [x_ft[:, :, :m1, :m2].reshape(B, Cin, M),
         x_ft[:, :, Nx - m1:, :m2].reshape(B, Cin, M)],
        axis=-1)                                             # (B, Cin, 2M)
    pad_m = ((0, 0), (0, 0), (0, Mp - 2 * M))
    xr = jnp.pad(jnp.real(corners).astype(jnp.float32), pad_m)
    xi = jnp.pad(jnp.imag(corners).astype(jnp.float32), pad_m)

    out_r, out_i = spectral_mix(xr, xi, wr, wi)              # (B, Cp_out, Mp)
    out_c = (out_r[:, :Cout, :2 * M]
             + 1j * out_i[:, :Cout, :2 * M]).reshape(B, Cout, 2, m1, m2)

    # Assemble out_ft by pad + concat (no full-size zeros + scatter).
    pad_cols = ((0, 0), (0, 0), (0, 0), (0, Nyf - m2))
    top = jnp.pad(out_c[:, :, 0], pad_cols)                  # (B, Cout, m1, Nyf)
    bot = jnp.pad(out_c[:, :, 1], pad_cols)
    mid = jnp.zeros((B, Cout, Nx - 2 * m1, Nyf), top.dtype)
    out_ft = jnp.concatenate([top, mid, bot], axis=2)        # (B, Cout, Nx, Nyf)
    spec = jnp.fft.irfft2(out_ft, s=(Nx, Ny)).astype(jnp.float32)

    # ---- physical path: fused 1x1 conv + add + tanh (no layout transposes) -
    HW = Nx * Ny
    out = fused_conv_add_tanh(spec.reshape(B, Cout, HW),
                              x.astype(jnp.float32).reshape(B, Cin, HW),
                              cw, cb)                        # (B, Cout, HW)
    return out.reshape(B, Cout, Nx, Ny)


def fourier_block_2d_apply(x, prepared):
    return fourier_block_2d(x, prepared["wr"], prepared["wi"],
                            prepared["cw"], prepared["cb"],
                            n_modes=prepared["n_modes"],
                            out_channels=prepared["out_channels"])


# ----------------------------------------------------------------------------
# Pure-JAX reference (mirrors the PyTorch forward exactly)
# ----------------------------------------------------------------------------
def reference(x, params, n_modes):
    w1r, w1i, w2r, w2i, cw, cb = params
    B, Cin, Nx, Ny = x.shape
    Cout = w1r.shape[1]
    m1, m2 = n_modes
    w1 = w1r + 1j * w1i
    w2 = w2r + 1j * w2i
    x_ft = jnp.fft.rfft2(x)
    out_ft = jnp.zeros((B, Cout, Nx, Ny // 2 + 1), jnp.complex64)
    out_ft = out_ft.at[:, :, :m1, :m2].set(
        jnp.einsum('bixy,ioxy->boxy', x_ft[:, :, :m1, :m2], w1))
    out_ft = out_ft.at[:, :, Nx - m1:, :m2].set(
        jnp.einsum('bixy,ioxy->boxy', x_ft[:, :, Nx - m1:, :m2], w2))
    spec = jnp.fft.irfft2(out_ft, s=(Nx, Ny))
    lin = jnp.einsum('oi,bihw->bohw', cw, x) + cb[None, :, None, None]
    return jnp.tanh(spec + lin)


if __name__ == "__main__":
    B, Cin, Cout = 2, 4, 4
    Nx = Ny = 16
    n_modes = (5, 5)
    m1, m2 = n_modes

    key = jax.random.PRNGKey(0)
    k = jax.random.split(key, 8)

    # SpectralConvBlock2D weights: scale * rand(Cin, Cout, m1, m2) complex
    scale = 1.0 / (Cin * Cout)
    w1r = scale * jax.random.uniform(k[0], (Cin, Cout, m1, m2), jnp.float32)
    w1i = scale * jax.random.uniform(k[1], (Cin, Cout, m1, m2), jnp.float32)
    w2r = scale * jax.random.uniform(k[2], (Cin, Cout, m1, m2), jnp.float32)
    w2i = scale * jax.random.uniform(k[3], (Cin, Cout, m1, m2), jnp.float32)

    # nn.Conv2d(Cin, Cout, 1) weights (kaiming-uniform-like bounds, deterministic)
    bound = 1.0 / np.sqrt(Cin)
    cw = jax.random.uniform(k[4], (Cout, Cin), jnp.float32, -bound, bound)
    cb = jax.random.uniform(k[5], (Cout,), jnp.float32, -bound, bound)

    x = jax.random.normal(k[6], (B, Cin, Nx, Ny), jnp.float32)

    prepared = prepare_params(w1r, w1i, w2r, w2i, cw, cb, n_modes)

    out = jax.block_until_ready(fourier_block_2d_apply(x, prepared))
    ref = jax.block_until_ready(
        reference(x, (w1r, w1i, w2r, w2i, cw, cb), n_modes))

    assert out.shape == (B, Cout, Nx, Ny)
    np.testing.assert_allclose(np.asarray(out), np.asarray(ref),
                               atol=1e-4, rtol=1e-4)
    print("KERNEL_OK")
</pallas_src>

<mosaic_0001>
module attributes {stable_mosaic.version = 11 : i64} {
  func.func @kernel(%arg0: i32, %arg1: memref<2x4x128xf32, #tpu.memory_space<vmem>>, %arg2: memref<2x4x128xf32, #tpu.memory_space<vmem>>, %arg3: memref<4x8x128xf32, #tpu.memory_space<vmem>>, %arg4: memref<4x8x128xf32, #tpu.memory_space<vmem>>, %arg5: memref<2x8x128xf32, #tpu.memory_space<vmem>>, %arg6: memref<2x8x128xf32, #tpu.memory_space<vmem>>) attributes {dimension_semantics = [#tpu.dimension_semantics<parallel>], iteration_bounds = array<i64: 1>, scalar_prefetch = 0 : i64, scratch_operands = 0 : i64, tpu.core_type = #tpu.core_type<tc>, window_params = [{transform_indices = @transform_0, window_bounds = array<i64: 2, 4, 128>}, {transform_indices = @transform_1, window_bounds = array<i64: 2, 4, 128>}, {transform_indices = @transform_2, window_bounds = array<i64: 4, 8, 128>}, {transform_indices = @transform_3, window_bounds = array<i64: 4, 8, 128>}, {transform_indices = @transform_4, window_bounds = array<i64: 2, 8, 128>}, {transform_indices = @transform_5, window_bounds = array<i64: 2, 8, 128>}]} {
    %cst = arith.constant 0.000000e+00 : f32
    %0 = vector.broadcast %cst : f32 to vector<2x8x128xf32>
    %cst_0 = arith.constant 0.000000e+00 : f32
    %1 = vector.broadcast %cst_0 : f32 to vector<2x8x128xf32>
    %c0 = arith.constant 0 : index
    %c0_1 = arith.constant 0 : index
    %c0_2 = arith.constant 0 : index
    %2 = vector.load %arg1[%c0, %c0_1, %c0_2] : memref<2x4x128xf32, #tpu.memory_space<vmem>>, vector<2x1x128xf32>
    %c0_3 = arith.constant 0 : index
    %c0_4 = arith.constant 0 : index
    %c0_5 = arith.constant 0 : index
    %3 = vector.load %arg2[%c0_3, %c0_4, %c0_5] : memref<2x4x128xf32, #tpu.memory_space<vmem>>, vector<2x1x128xf32>
    %c0_6 = arith.constant 0 : index
    %c0_7 = arith.constant 0 : index
    %c0_8 = arith.constant 0 : index
    %4 = vector.load %arg3[%c0_6, %c0_7, %c0_8] : memref<4x8x128xf32, #tpu.memory_space<vmem>>, vector<1x8x128xf32>
    %c0_9 = arith.constant 0 : index
    %c0_10 = arith.constant 0 : index
    %c0_11 = arith.constant 0 : index
    %5 = vector.load %arg4[%c0_9, %c0_10, %c0_11] : memref<4x8x128xf32, #tpu.memory_space<vmem>>, vector<1x8x128xf32>
    %6 = vector.broadcast %2 : vector<2x1x128xf32> to vector<2x8x128xf32>
    %7 = vector.broadcast %4 : vector<1x8x128xf32> to vector<2x8x128xf32>
    %8 = arith.mulf %6, %7 : vector<2x8x128xf32>
    %9 = vector.broadcast %3 : vector<2x1x128xf32> to vector<2x8x128xf32>
    %10 = vector.broadcast %5 : vector<1x8x128xf32> to vector<2x8x128xf32>
    %11 = arith.mulf %9, %10 : vector<2x8x128xf32>
    %12 = arith.subf %8, %11 : vector<2x8x128xf32>
    %13 = arith.addf %0, %12 : vector<2x8x128xf32>
    %14 = vector.broadcast %2 : vector<2x1x128xf32> to vector<2x8x128xf32>
    %15 = vector.broadcast %5 : vector<1x8x128xf32> to vector<2x8x128xf32>
    %16 = arith.mulf %14, %15 : vector<2x8x128xf32>
    %17 = vector.broadcast %3 : vector<2x1x128xf32> to vector<2x8x128xf32>
    %18 = vector.broadcast %4 : vector<1x8x128xf32> to vector<2x8x128xf32>
    %19 = arith.mulf %17, %18 : vector<2x8x128xf32>
    %20 = arith.addf %16, %19 : vector<2x8x128xf32>
    %21 = arith.addf %1, %20 : vector<2x8x128xf32>
    %c0_12 = arith.constant 0 : index
    %c1 = arith.constant 1 : index
    %c0_13 = arith.constant 0 : index
    %22 = vector.load %arg1[%c0_12, %c1, %c0_13] : memref<2x4x128xf32, #tpu.memory_space<vmem>>, vector<2x1x128xf32>
    %c0_14 = arith.constant 0 : index
    %c1_15 = arith.constant 1 : index
    %c0_16 = arith.constant 0 : index
    %23 = vector.load %arg2[%c0_14, %c1_15, %c0_16] : memref<2x4x128xf32, #tpu.memory_space<vmem>>, vector<2x1x128xf32>
    %c1_17 = arith.constant 1 : index
    %c0_18 = arith.constant 0 : index
    %c0_19 = arith.constant 0 : index
    %24 = vector.load %arg3[%c1_17, %c0_18, %c0_19] : memref<4x8x128xf32, #tpu.memory_space<vmem>>, vector<1x8x128xf32>
    %c1_20 = arith.constant 1 : index
    %c0_21 = arith.constant 0 : index
    %c0_22 = arith.constant 0 : index
    %25 = vector.load %arg4[%c1_20, %c0_21, %c0_22] : memref<4x8x128xf32, #tpu.memory_space<vmem>>, vector<1x8x128xf32>
    %26 = vector.broadcast %22 : vector<2x1x128xf32> to vector<2x8x128xf32>
    %27 = vector.broadcast %24 : vector<1x8x128xf32> to vector<2x8x128xf32>
    %28 = arith.mulf %26, %27 : vector<2x8x128xf32>
    %29 = vector.broadcast %23 : vector<2x1x128xf32> to vector<2x8x128xf32>
    %30 = vector.broadcast %25 : vector<1x8x128xf32> to vector<2x8x128xf32>
    %31 = arith.mulf %29, %30 : vector<2x8x128xf32>
    %32 = arith.subf %28, %31 : vector<2x8x128xf32>
    %33 = arith.addf %13, %32 : vector<2x8x128xf32>
    %34 = vector.broadcast %22 : vector<2x1x128xf32> to vector<2x8x128xf32>
    %35 = vector.broadcast %25 : vector<1x8x128xf32> to vector<2x8x128xf32>
    %36 = arith.mulf %34, %35 : vector<2x8x128xf32>
    %37 = vector.broadcast %23 : vector<2x1x128xf32> to vector<2x8x128xf32>
    %38 = vector.broadcast %24 : vector<1x8x128xf32> to vector<2x8x128xf32>
    %39 = arith.mulf %37, %38 : vector<2x8x128xf32>
    %40 = arith.addf %36, %39 : vector<2x8x128xf32>
    %41 = arith.addf %21, %40 : vector<2x8x128xf32>
    %c0_23 = arith.constant 0 : index
    %c2 = arith.constant 2 : index
    %c0_24 = arith.constant 0 : index
    %42 = vector.load %arg1[%c0_23, %c2, %c0_24] : memref<2x4x128xf32, #tpu.memory_space<vmem>>, vector<2x1x128xf32>
    %c0_25 = arith.constant 0 : index
    %c2_26 = arith.constant 2 : index
    %c0_27 = arith.constant 0 : index
    %43 = vector.load %arg2[%c0_25, %c2_26, %c0_27] : memref<2x4x128xf32, #tpu.memory_space<vmem>>, vector<2x1x128xf32>
    %c2_28 = arith.constant 2 : index
    %c0_29 = arith.constant 0 : index
    %c0_30 = arith.constant 0 : index
    %44 = vector.load %arg3[%c2_28, %c0_29, %c0_30] : memref<4x8x128xf32, #tpu.memory_space<vmem>>, vector<1x8x128xf32>
    %c2_31 = arith.constant 2 : index
    %c0_32 = arith.constant 0 : index
    %c0_33 = arith.constant 0 : index
    %45 = vector.load %arg4[%c2_31, %c0_32, %c0_33] : memref<4x8x128xf32, #tpu.memory_space<vmem>>, vector<1x8x128xf32>
    %46 = vector.broadcast %42 : vector<2x1x128xf32> to vector<2x8x128xf32>
    %47 = vector.broadcast %44 : vector<1x8x128xf32> to vector<2x8x128xf32>
    %48 = arith.mulf %46, %47 : vector<2x8x128xf32>
    %49 = vector.broadcast %43 : vector<2x1x128xf32> to vector<2x8x128xf32>
    %50 = vector.broadcast %45 : vector<1x8x128xf32> to vector<2x8x128xf32>
    %51 = arith.mulf %49, %50 : vector<2x8x128xf32>
    %52 = arith.subf %48, %51 : vector<2x8x128xf32>
    %53 = arith.addf %33, %52 : vector<2x8x128xf32>
    %54 = vector.broadcast %42 : vector<2x1x128xf32> to vector<2x8x128xf32>
    %55 = vector.broadcast %45 : vector<1x8x128xf32> to vector<2x8x128xf32>
    %56 = arith.mulf %54, %55 : vector<2x8x128xf32>
    %57 = vector.broadcast %43 : vector<2x1x128xf32> to vector<2x8x128xf32>
    %58 = vector.broadcast %44 : vector<1x8x128xf32> to vector<2x8x128xf32>
    %59 = arith.mulf %57, %58 : vector<2x8x128xf32>
    %60 = arith.addf %56, %59 : vector<2x8x128xf32>
    %61 = arith.addf %41, %60 : vector<2x8x128xf32>
    %c0_34 = arith.constant 0 : index
    %c3 = arith.constant 3 : index
    %c0_35 = arith.constant 0 : index
    %62 = vector.load %arg1[%c0_34, %c3, %c0_35] : memref<2x4x128xf32, #tpu.memory_space<vmem>>, vector<2x1x128xf32>
    %c0_36 = arith.constant 0 : index
    %c3_37 = arith.constant 3 : index
    %c0_38 = arith.constant 0 : index
    %63 = vector.load %arg2[%c0_36, %c3_37, %c0_38] : memref<2x4x128xf32, #tpu.memory_space<vmem>>, vector<2x1x128xf32>
    %c3_39 = arith.constant 3 : index
    %c0_40 = arith.constant 0 : index
    %c0_41 = arith.constant 0 : index
    %64 = vector.load %arg3[%c3_39, %c0_40, %c0_41] : memref<4x8x128xf32, #tpu.memory_space<vmem>>, vector<1x8x128xf32>
    %c3_42 = arith.constant 3 : index
    %c0_43 = arith.constant 0 : index
    %c0_44 = arith.constant 0 : index
    %65 = vector.load %arg4[%c3_42, %c0_43, %c0_44] : memref<4x8x128xf32, #tpu.memory_space<vmem>>, vector<1x8x128xf32>
    %66 = vector.broadcast %62 : vector<2x1x128xf32> to vector<2x8x128xf32>
    %67 = vector.broadcast %64 : vector<1x8x128xf32> to vector<2x8x128xf32>
    %68 = arith.mulf %66, %67 : vector<2x8x128xf32>
    %69 = vector.broadcast %63 : vector<2x1x128xf32> to vector<2x8x128xf32>
    %70 = vector.broadcast %65 : vector<1x8x128xf32> to vector<2x8x128xf32>
    %71 = arith.mulf %69, %70 : vector<2x8x128xf32>
    %72 = arith.subf %68, %71 : vector<2x8x128xf32>
    %73 = arith.addf %53, %72 : vector<2x8x128xf32>
    %74 = vector.broadcast %62 : vector<2x1x128xf32> to vector<2x8x128xf32>
    %75 = vector.broadcast %65 : vector<1x8x128xf32> to vector<2x8x128xf32>
    %76 = arith.mulf %74, %75 : vector<2x8x128xf32>
    %77 = vector.broadcast %63 : vector<2x1x128xf32> to vector<2x8x128xf32>
    %78 = vector.broadcast %64 : vector<1x8x128xf32> to vector<2x8x128xf32>
    %79 = arith.mulf %77, %78 : vector<2x8x128xf32>
    %80 = arith.addf %76, %79 : vector<2x8x128xf32>
    %81 = arith.addf %61, %80 : vector<2x8x128xf32>
    %c0_45 = arith.constant 0 : index
    %c0_46 = arith.constant 0 : index
    %c0_47 = arith.constant 0 : index
    %82 = vector.load %arg5[%c0_45, %c0_46, %c0_47] : memref<2x8x128xf32, #tpu.memory_space<vmem>>, vector<2x8x128xf32>
    tpu.vector_store %arg5[%c0_45, %c0_46, %c0_47], %73 {strides = array<i32>} : memref<2x8x128xf32, #tpu.memory_space<vmem>>, vector<2x8x128xf32>,
    %c0_48 = arith.constant 0 : index
    %c0_49 = arith.constant 0 : index
    %c0_50 = arith.constant 0 : index
    %83 = vector.load %arg6[%c0_48, %c0_49, %c0_50] : memref<2x8x128xf32, #tpu.memory_space<vmem>>, vector<2x8x128xf32>
    tpu.vector_store %arg6[%c0_48, %c0_49, %c0_50], %81 {strides = array<i32>} : memref<2x8x128xf32, #tpu.memory_space<vmem>>, vector<2x8x128xf32>,
    return
  }
  func.func @transform_0(%arg0: i32) -> (i32, i32, i32) {
    %c0_i32 = arith.constant 0 : i32
    %c0_i32_0 = arith.constant 0 : i32
    %c0_i32_1 = arith.constant 0 : i32
    return %c0_i32, %c0_i32_0, %arg0 : i32, i32, i32
  }
  func.func @transform_1(%arg0: i32) -> (i32, i32, i32) {
    %c0_i32 = arith.constant 0 : i32
    %c0_i32_0 = arith.constant 0 : i32
    %c0_i32_1 = arith.constant 0 : i32
    return %c0_i32, %c0_i32_0, %arg0 : i32, i32, i32
  }
  func.func @transform_2(%arg0: i32) -> (i32, i32, i32) {
    %c0_i32 = arith.constant 0 : i32
    %c0_i32_0 = arith.constant 0 : i32
    %c0_i32_1 = arith.constant 0 : i32
    return %c0_i32, %c0_i32_0, %arg0 : i32, i32, i32
  }
  func.func @transform_3(%arg0: i32) -> (i32, i32, i32) {
    %c0_i32 = arith.constant 0 : i32
    %c0_i32_0 = arith.constant 0 : i32
    %c0_i32_1 = arith.constant 0 : i32
    return %c0_i32, %c0_i32_0, %arg0 : i32, i32, i32
  }
  func.func @transform_4(%arg0: i32) -> (i32, i32, i32) {
    %c0_i32 = arith.constant 0 : i32
    %c0_i32_0 = arith.constant 0 : i32
    %c0_i32_1 = arith.constant 0 : i32
    return %c0_i32, %c0_i32_0, %arg0 : i32, i32, i32
  }
  func.func @transform_5(%arg0: i32) -> (i32, i32, i32) {
    %c0_i32 = arith.constant 0 : i32
    %c0_i32_0 = arith.constant 0 : i32
    %c0_i32_1 = arith.constant 0 : i32
    return %c0_i32, %c0_i32_0, %arg0 : i32, i32, i32
  }
}

module attributes {stable_mosaic.version = 11 : i64} {
  func.func @kernel(%arg0: i32, %arg1: i32, %arg2: memref<1x4x128xf32, #tpu.memory_space<vmem>>, %arg3: memref<1x4x128xf32, #tpu.memory_space<vmem>>, %arg4: memref<4x4xf32, #tpu.memory_space<vmem>>, %arg5: memref<4x1xf32, #tpu.memory_space<vmem>>, %arg6: memref<1x4x128xf32, #tpu.memory_space<vmem>>) attributes {dimension_semantics = [#tpu.dimension_semantics<parallel>, #tpu.dimension_semantics<parallel>], iteration_bounds = array<i64: 2, 2>, scalar_prefetch = 0 : i64, scratch_operands = 0 : i64, tpu.core_type = #tpu.core_type<tc>, window_params = [{transform_indices = @transform_0, window_bounds = array<i64: 1, 4, 128>}, {transform_indices = @transform_1, window_bounds = array<i64: 1, 4, 128>}, {pipeline_mode = #tpu.pipeline_mode<synchronous>, transform_indices = @transform_2, window_bounds = array<i64: 4, 4>}, {pipeline_mode = #tpu.pipeline_mode<synchronous>, transform_indices = @transform_3, window_bounds = array<i64: 4, 1>}, {transform_indices = @transform_4, window_bounds = array<i64: 1, 4, 128>}]} {
    %c0 = arith.constant 0 : index
    %c0_0 = arith.constant 0 : index
    %c0_1 = arith.constant 0 : index
    %0 = vector.load %arg2[%c0, %c0_0, %c0_1] : memref<1x4x128xf32, #tpu.memory_space<vmem>>, vector<1x4x128xf32>
    %1 = vector.shape_cast %0 : vector<1x4x128xf32> to vector<4x128xf32>
    %c0_2 = arith.constant 0 : index
    %c0_3 = arith.constant 0 : index
    %c0_4 = arith.constant 0 : index
    %2 = vector.load %arg3[%c0_2, %c0_3, %c0_4] : memref<1x4x128xf32, #tpu.memory_space<vmem>>, vector<1x4x128xf32>
    %3 = vector.shape_cast %2 : vector<1x4x128xf32> to vector<4x128xf32>
    %c0_5 = arith.constant 0 : index
    %c0_6 = arith.constant 0 : index
    %4 = vector.load %arg4[%c0_5, %c0_6] : memref<4x4xf32, #tpu.memory_space<vmem>>, vector<4x4xf32>
    %5 = vector.extract_strided_slice %4 {offsets = [0, 0], sizes = [4, 1], strides = [1, 1]} : vector<4x4xf32> to vector<4x1xf32>
    %6 = vector.extract_strided_slice %3 {offsets = [0, 0], sizes = [1, 128], strides = [1, 1]} : vector<4x128xf32> to vector<1x128xf32>
    %7 = vector.broadcast %5 : vector<4x1xf32> to vector<4x128xf32>
    %8 = vector.broadcast %6 : vector<1x128xf32> to vector<4x128xf32>
    %9 = arith.mulf %7, %8 : vector<4x128xf32>
    %10 = vector.extract_strided_slice %4 {offsets = [0, 1], sizes = [4, 1], strides = [1, 1]} : vector<4x4xf32> to vector<4x1xf32>
    %11 = vector.extract_strided_slice %3 {offsets = [1, 0], sizes = [1, 128], strides = [1, 1]} : vector<4x128xf32> to vector<1x128xf32>
    %12 = vector.broadcast %10 : vector<4x1xf32> to vector<4x128xf32>
    %13 = vector.broadcast %11 : vector<1x128xf32> to vector<4x128xf32>
    %14 = arith.mulf %12, %13 : vector<4x128xf32>
    %15 = arith.addf %9, %14 : vector<4x128xf32>
    %16 = vector.extract_strided_slice %4 {offsets = [0, 2], sizes = [4, 1], strides = [1, 1]} : vector<4x4xf32> to vector<4x1xf32>
    %17 = vector.extract_strided_slice %3 {offsets = [2, 0], sizes = [1, 128], strides = [1, 1]} : vector<4x128xf32> to vector<1x128xf32>
    %18 = vector.broadcast %16 : vector<4x1xf32> to vector<4x128xf32>
    %19 = vector.broadcast %17 : vector<1x128xf32> to vector<4x128xf32>
    %20 = arith.mulf %18, %19 : vector<4x128xf32>
    %21 = arith.addf %15, %20 : vector<4x128xf32>
    %22 = vector.extract_strided_slice %4 {offsets = [0, 3], sizes = [4, 1], strides = [1, 1]} : vector<4x4xf32> to vector<4x1xf32>
    %23 = vector.extract_strided_slice %3 {offsets = [3, 0], sizes = [1, 128], strides = [1, 1]} : vector<4x128xf32> to vector<1x128xf32>
    %24 = vector.broadcast %22 : vector<4x1xf32> to vector<4x128xf32>
    %25 = vector.broadcast %23 : vector<1x128xf32> to vector<4x128xf32>
    %26 = arith.mulf %24, %25 : vector<4x128xf32>
    %27 = arith.addf %21, %26 : vector<4x128xf32>
    %c0_7 = arith.constant 0 : index
    %c0_8 = arith.constant 0 : index
    %28 = vector.load %arg5[%c0_7, %c0_8] : memref<4x1xf32, #tpu.memory_space<vmem>>, vector<4x1xf32>
    %29 = vector.broadcast %28 : vector<4x1xf32> to vector<4x128xf32>
    %30 = arith.addf %1, %29 : vector<4x128xf32>
    %31 = arith.addf %30, %27 : vector<4x128xf32>
    %32 = math.tanh %31 : vector<4x128xf32>
    %c0_9 = arith.constant 0 : index
    %c0_10 = arith.constant 0 : index
    %c0_11 = arith.constant 0 : index
    %33 = vector.load %arg6[%c0_9, %c0_10, %c0_11] : memref<1x4x128xf32, #tpu.memory_space<vmem>>, vector<1x4x128xf32>
    %34 = vector.shape_cast %33 : vector<1x4x128xf32> to vector<4x128xf32>
    %35 = vector.shape_cast %32 : vector<4x128xf32> to vector<1x4x128xf32>
    tpu.vector_store %arg6[%c0_9, %c0_10, %c0_11], %35 {strides = array<i32>} : memref<1x4x128xf32, #tpu.memory_space<vmem>>, vector<1x4x128xf32>,
    return
  }
  func.func @transform_0(%arg0: i32, %arg1: i32) -> (i32, i32, i32) {
    %c0_i32 = arith.constant 0 : i32
    %c0_i32_0 = arith.constant 0 : i32
    return %arg0, %c0_i32, %arg1 : i32, i32, i32
  }
  func.func @transform_1(%arg0: i32, %arg1: i32) -> (i32, i32, i32) {
    %c0_i32 = arith.constant 0 : i32
    %c0_i32_0 = arith.constant 0 : i32
    return %arg0, %c0_i32, %arg1 : i32, i32, i32
  }
  func.func @transform_2(%arg0: i32, %arg1: i32) -> (i32, i32) {
    %c0_i32 = arith.constant 0 : i32
    %c0_i32_0 = arith.constant 0 : i32
    %c0_i32_1 = arith.constant 0 : i32
    return %c0_i32, %c0_i32_0 : i32, i32
  }
  func.func @transform_3(%arg0: i32, %arg1: i32) -> (i32, i32) {
    %c0_i32 = arith.constant 0 : i32
    %c0_i32_0 = arith.constant 0 : i32
    %c0_i32_1 = arith.constant 0 : i32
    return %c0_i32, %c0_i32_0 : i32, i32
  }
  func.func @transform_4(%arg0: i32, %arg1: i32) -> (i32, i32, i32) {
    %c0_i32 = arith.constant 0 : i32
    %c0_i32_0 = arith.constant 0 : i32
    return %arg0, %c0_i32, %arg1 : i32, i32, i32
  }
}

</mosaic_0001>

<bundles_post_ra>
// kernel: fourier_block_2d.2
= control target key start
LH: loop header
LB: loop body
LE: loop exit
PB: predicated region body
PF: predicated region fallthrough
CT: control target
= control target key end

     0   :  { %s331_s0 = inlined_call_operand.vmem [shape: f32[2,4,128], index: 0, kind: input, shape index: {}]   ;;  %s332_s1 = inlined_call_operand.vmem [shape: f32[2,4,128], index: 1, kind: input, shape index: {}]   ;;  %s333_s2 = inlined_call_operand.vmem [shape: f32[4,8,128], index: 2, kind: input, shape index: {}]   ;;  %s334_s3 = inlined_call_operand.vmem [shape: f32[4,8,128], index: 3, kind: input, shape index: {}]   ;;  %s335_s4 = inlined_call_operand.vmem [shape: f32[2,8,128], index: 4, kind: output, shape index: {0}]   ;;  %s336_s5 = inlined_call_operand.vmem [shape: f32[2,8,128], index: 5, kind: output, shape index: {1}]  }
   0x1   :  { %v189_v0 = vld [vmem:[%s331_s0] ss:$0 sm:$0xff]  ;;  %v195_v5 = vld [vmem:[%s331_s0 + $0x1] ss:$0 sm:$0xff]  ;;  %v193_v9 = vld [vmem:[%s333_s2 + $0x8] sm:$0xff] }
   0x2   :  { %v191_v1 = vld [vmem:[%s332_s1] ss:$0 sm:$0xff]  ;;  %v197_v6 = vld [vmem:[%s332_s1 + $0x1] ss:$0 sm:$0xff]  ;;  %v194_v10 = vld [vmem:[%s334_s3 + $0x8] sm:$0xff]  ;;  %v73_v13 = vmul.f32 %v195_v5, %v193_v9 }
   0x3   :  { %v250_v2 = vld [vmem:[%s333_s2] sm:$0xff]  ;;  %v83_v14 = vmul.f32 %v197_v6, %v194_v10  ;;  %v199_v16 = vld [vmem:[%s333_s2 + $0x10] sm:$0xff]  ;;  %v89_v18 = vmul.f32 %v195_v5, %v194_v10  ;;  %v91_v19 = vmul.f32 %v197_v6, %v193_v9  ;;  %v205_v25 = vld [vmem:[%s333_s2 + $0x18] sm:$0xff] }
   0x4   :  { %v24_v3 = vld [vmem:[%s334_s3] sm:$0xff]  ;;  %v33_v4 = vmul.f32 %v189_v0, %v250_v2  ;;  %v51_v7 = vmul.f32 %v191_v1, %v250_v2  ;;  %v200_v17 = vld [vmem:[%s334_s3 + $0x10] sm:$0xff]  ;;  %v206_v28 = vld [vmem:[%s334_s3 + $0x18] sm:$0xff] }
   0x5   :  { %v43_v8 = vmul.f32 %v191_v1, %v24_v3  ;;  %v201_v11 = vld [vmem:[%s331_s0 + $0x2] ss:$0 sm:$0xff]  ;;  %v49_v12 = vmul.f32 %v189_v0, %v24_v3  ;;  %v207_v23 = vld [vmem:[%s331_s0 + $0x3] ss:$0 sm:$0xff]  ;;  %v85_v27 = vsub.f32 %v73_v13, %v83_v14  ;;  %v190_v30 = vld [vmem:[%s331_s0 + $0x4] ss:$0 sm:$0xff]  ;;  %v93_v32 = vadd.f32 %v91_v19, %v89_v18 }
   0x6   :  { %v203_v15 = vld [vmem:[%s332_s1 + $0x2] ss:$0 sm:$0xff]  ;;  %v113_v21 = vmul.f32 %v201_v11, %v199_v16  ;;  %v209_v24 = vld [vmem:[%s332_s1 + $0x3] ss:$0 sm:$0xff]  ;;  %v153_v29 = vmul.f32 %v207_v23, %v205_v25  ;;  %v192_v31 = vld [vmem:[%s332_s1 + $0x4] ss:$0 sm:$0xff]  ;;  %v129_v33 = vmul.f32 %v201_v11, %v200_v17  ;;  %v34_v36 = vmul.f32 %v190_v30, %v250_v2 }
   0x7   :  { %v45_v20 = vsub.f32 %v33_v4, %v43_v8  ;;  %v123_v22 = vmul.f32 %v203_v15, %v200_v17  ;;  %v53_v26 = vadd.f32 %v51_v7, %v49_v12  ;;  %v163_v35 = vmul.f32 %v209_v24, %v206_v28  ;;  %v196_v38 = vld [vmem:[%s331_s0 + $0x5] ss:$0 sm:$0xff]  ;;  %v202_v40 = vld [vmem:[%s331_s0 + $0x6] ss:$0 sm:$0xff]  ;;  %v208_v46 = vld [vmem:[%s331_s0 + $0x7] ss:$0 sm:$0xff] }
   0x8   :  { %v44_v37 = vmul.f32 %v192_v31, %v24_v3  ;;  %v198_v39 = vld [vmem:[%s332_s1 + $0x5] ss:$0 sm:$0xff]  ;;  %v74_v42 = vmul.f32 %v196_v38, %v193_v9  ;;  %v204_v44 = vld [vmem:[%s332_s1 + $0x6] ss:$0 sm:$0xff]  ;;  %v114_v45 = vmul.f32 %v202_v40, %v199_v16  ;;  %v210_v47 = vld [vmem:[%s332_s1 + $0x7] ss:$0 sm:$0xff]  ;;  %v154_v51 = vmul.f32 %v208_v46, %v205_v25 }
   0x9   :  { %v125_v34 = vsub.f32 %v113_v21, %v123_v22  ;;  %v87_v41 = vadd.f32 %v85_v27, %v45_v20  ;;  %v84_v43 = vmul.f32 %v198_v39, %v194_v10  ;;  %v165_v48 = vsub.f32 %v153_v29, %v163_v35 }
   0xa   :  { %v46_v49 = vsub.f32 %v34_v36, %v44_v37  ;;  %v124_v50 = vmul.f32 %v204_v44, %v200_v17  ;;  %v164_v54 = vmul.f32 %v210_v47, %v206_v28  ;;  %v95_v55 = vadd.f32 %v93_v32, %v53_v26 }
   0xb   :  { %v127_v52 = vadd.f32 %v125_v34, %v87_v41  ;;  %v86_v53 = vsub.f32 %v74_v42, %v84_v43  ;;  %v131_v57 = vmul.f32 %v203_v15, %v199_v16  ;;  %v169_v58 = vmul.f32 %v207_v23, %v206_v28 }
   0xc   :  { %v126_v56 = vsub.f32 %v114_v45, %v124_v50  ;;  %v171_v59 = vmul.f32 %v209_v24, %v205_v25  ;;  %v166_v62 = vsub.f32 %v154_v51, %v164_v54  ;;  %v50_v63 = vmul.f32 %v190_v30, %v24_v3 }
   0xd   :  { %v167_v60 = vadd.f32 %v165_v48, %v127_v52  ;;  %v88_v61 = vadd.f32 %v86_v53, %v46_v49  ;;  %v133_v0 = vadd.f32 %v131_v57, %v129_v33  ;;  %v52_v4 = vmul.f32 %v192_v31, %v250_v2 }
   0xe   :  { %v173_v1 = vadd.f32 %v171_v59, %v169_v58  ;;  %v90_v5 = vmul.f32 %v196_v38, %v194_v10  ;;  %v92_v7 = vmul.f32 %v198_v39, %v193_v9  ;;  %v130_v8 = vmul.f32 %v202_v40, %v200_v17 }
   0xf   :  { %177 = vst [vmem:[%s335_s4] sm:$0xff] %v167_v60  ;;  %v128_v6 = vadd.f32 %v126_v56, %v88_v61  ;;  %v132_v11 = vmul.f32 %v204_v44, %v199_v16  ;;  %v135_v12 = vadd.f32 %v133_v0, %v95_v55  ;;  %v54_v13 = vadd.f32 %v52_v4, %v50_v63 }
  0x10   :  { %v170_v14 = vmul.f32 %v208_v46, %v206_v28  ;;  %v172_v15 = vmul.f32 %v210_v47, %v205_v25  ;;  %v94_v19 = vadd.f32 %v92_v7, %v90_v5 }
  0x11   :  { %v168_v18 = vadd.f32 %v166_v62, %v128_v6  ;;  %v134_v3 = vadd.f32 %v132_v11, %v130_v8  ;;  %v175_v20 = vadd.f32 %v173_v1, %v135_v12 }
  0x12   :  { %v96_v2 = vadd.f32 %v94_v19, %v54_v13  ;;  %v174_v10 = vadd.f32 %v172_v15, %v170_v14 }
  0x13   :  { %178 = vst [vmem:[%s335_s4 + $0x8] sm:$0xff] %v168_v18  ;;  %179 = vst [vmem:[%s336_s5] sm:$0xff] %v175_v20 }
  0x14   :  { %v136_v9 = vadd.f32 %v134_v3, %v96_v2 }
  0x16   :  { %v176_v16 = vadd.f32 %v174_v10, %v136_v9 }
  0x18   :  { %180 = vst [vmem:[%s336_s5 + $0x8] sm:$0xff] %v176_v16 }

// kernel: reverse.0
= control target key start
LH: loop header
LB: loop body
LE: loop exit
PB: predicated region body
PF: predicated region fallthrough
CT: control target
= control target key end

     0   :  { %v72_v3 = vlaneseq  ;;  %v65_v9 = vld [vmem:[#allocation0 + $0x7] ss:$-1 sm:$0xff]  ;;  %v79_v12 = vld [vmem:[#allocation0 + $0x17] ss:$-1 sm:$0xff]  ;;  %s331_s0 = inlined_call_operand.vmem [shape: f32[2,4,16,7], index: 0, kind: input, shape index: {}]   ;;  %s332_s1 = inlined_call_operand.vmem [shape: f32[2,4,16,7], index: 1, kind: output, shape index: {}]  }
   0x1   :  { %v45_v0 = vld [vmem:[%s331_s0] sm:$0xff]  ;;  %v47_v1 = vld [vmem:[%s331_s0 + $0x8] sm:$0xff]  ;;  %v49_v2 = vld [vmem:[%s331_s0 + $0x10] sm:$0xff]  ;;  %v66_v10 = vrot.slane %v65_v9, 1  ;;  %v80_v14 = vrot.slane %v79_v12, 1 }
   0x2   :  { %46 = vst [vmem:[#allocation0 + $0x8] sm:$0xff] %v45_v0  ;;  %48 = vst [vmem:[#allocation0 + $0x18] sm:$0xff] %v47_v1  ;;  %v51_v4 = vld [vmem:[%s331_s0 + $0x18] sm:$0xff]  ;;  %v53_v5 = vld [vmem:[%s331_s0 + $0x20] sm:$0xff]  ;;  %v73_v11 = vshrl.u32 %v72_v3, 7 }
   0x3   :  { %50 = vst [vmem:[#allocation0 + $0x28] sm:$0xff] %v49_v2  ;;  %v55_v6 = vld [vmem:[%s331_s0 + $0x28] sm:$0xff]  ;;  %52 = vst [vmem:[#allocation0 + $0x38] sm:$0xff] %v51_v4  ;;  %v57_v7 = vld [vmem:[%s331_s0 + $0x30] sm:$0xff] }
   0x4   :  { %54 = vst [vmem:[#allocation0 + $0x48] sm:$0xff] %v53_v5  ;;  %56 = vst [vmem:[#allocation0 + $0x58] sm:$0xff] %v55_v6  ;;  %v59_v8 = vld [vmem:[%s331_s0 + $0x38] sm:$0xff]  ;;  %v93_v13 = vld [vmem:[#allocation0 + $0x27] ss:$-1 sm:$0xff]  ;;  %vm74_vm0 = vcmp.lt.s32.totalorder %v73_v11, 7 }
   0x5   :  { %58 = vst [vmem:[#allocation0 + $0x68] sm:$0xff] %v57_v7  ;;  %60 = vst [vmem:[#allocation0 + $0x78] sm:$0xff] %v59_v8  ;;  %v94_v15 = vrot.slane %v93_v13, 1  ;;  %v107_v16 = vld [vmem:[#allocation0 + $0x37] ss:$-1 sm:$0xff] }
   0x6   :  { %67 = vst [vmem:[#allocation1] sm:$0xff] %v66_v10  ;;  %v108_v17 = vrot.slane %v107_v16, 1  ;;  %v121_v18 = vld [vmem:[#allocation0 + $0x47] ss:$-1 sm:$0xff]  ;;  %v135_v19 = vld [vmem:[#allocation0 + $0x57] ss:$-1 sm:$0xff] }
   0x7   :  { %81 = vst [vmem:[#allocation1 + $0x8] sm:$0xff] %v80_v14  ;;  %95 = vst [vmem:[#allocation1 + $0x10] sm:$0xff] %v94_v15  ;;  %v122_v20 = vrot.slane %v121_v18, 1  ;;  %v136_v21 = vrot.slane %v135_v19, 1  ;;  %v149_v22 = vld [vmem:[#allocation0 + $0x67] ss:$-1 sm:$0xff] }
   0x8   :  { %v163_v23 = vld [vmem:[#allocation0 + $0x77] ss:$-1 sm:$0xff]  ;;  %109 = vst [vmem:[#allocation1 + $0x18] sm:$0xff] %v108_v17  ;;  %v150_v24 = vrot.slane %v149_v22, 1 }
   0x9   :  { %v164_v25 = vrot.slane %v163_v23, 1  ;;  %v70_v26 = vld [vmem:[#allocation0 + $0xf] ss:$-1 sm:$0xff]  ;;  %v84_v27 = vld [vmem:[#allocation0 + $0x1f] ss:$-1 sm:$0xff]  ;;  %123 = vst [vmem:[#allocation1 + $0x20] sm:$0xff] %v122_v20 }
   0xa   :  { %v98_v28 = vld [vmem:[#allocation0 + $0x2f] ss:$-1 sm:$0xff]  ;;  %137 = vst [vmem:[#allocation1 + $0x28] sm:$0xff] %v136_v21  ;;  %v71_v29 = vrot.slane %v70_v26, 1  ;;  %v85_v30 = vrot.slane %v84_v27, 1  ;;  %151 = vst [vmem:[#allocation1 + $0x30] sm:$0xff] %v150_v24 }
   0xb   :  { %v99_v31 = vrot.slane %v98_v28, 1  ;;  %v112_v32 = vld [vmem:[#allocation0 + $0x3f] ss:$-1 sm:$0xff]  ;;  %165 = vst [vmem:[#allocation1 + $0x38] sm:$0xff] %v164_v25  ;;  %v126_v34 = vld [vmem:[#allocation0 + $0x4f] ss:$-1 sm:$0xff] }
   0xc   :  { %v113_v33 = vrot.slane %v112_v32, 1  ;;  %v140_v35 = vld [vmem:[#allocation0 + $0x5f] ss:$-1 sm:$0xff]  ;;  %75 = vst.msk [vmem:[#allocation1] sm:$0xff] %vm74_vm0, %v71_v29  ;;  %89 = vst.msk [vmem:[#allocation1 + $0x8] sm:$0xff] %vm74_vm0, %v85_v30  ;;  %v127_v36 = vrot.slane %v126_v34, 1 }
   0xd   :  { %103 = vst.msk [vmem:[#allocation1 + $0x10] sm:$0xff] %vm74_vm0, %v99_v31  ;;  %v141_v37 = vrot.slane %v140_v35, 1  ;;  %v154_v38 = vld [vmem:[#allocation0 + $0x6f] ss:$-1 sm:$0xff]  ;;  %v168_v39 = vld [vmem:[#allocation0 + $0x7f] ss:$-1 sm:$0xff] }
   0xe   :  { %117 = vst.msk [vmem:[#allocation1 + $0x18] sm:$0xff] %vm74_vm0, %v113_v33  ;;  %v155_v40 = vrot.slane %v154_v38, 1  ;;  %v169_v41 = vrot.slane %v168_v39, 1  ;;  %131 = vst.msk [vmem:[#allocation1 + $0x20] sm:$0xff] %vm74_vm0, %v127_v36 }
   0xf   :  { %145 = vst.msk [vmem:[#allocation1 + $0x28] sm:$0xff] %vm74_vm0, %v141_v37 }
  0x10   :  { %159 = vst.msk [vmem:[#allocation1 + $0x30] sm:$0xff] %vm74_vm0, %v155_v40  ;;  %173 = vst.msk [vmem:[#allocation1 + $0x38] sm:$0xff] %vm74_vm0, %v169_v41 }
  0x13   :  { %v216_v42 = vld [vmem:[#allocation1] sm:$0xff]  ;;  %v218_v43 = vld [vmem:[#allocation1 + $0x8] sm:$0xff] }
  0x14   :  { %v220_v44 = vld [vmem:[#allocation1 + $0x10] sm:$0xff]  ;;  %217 = vst [vmem:[%s332_s1] sm:$0xff] %v216_v42  ;;  %219 = vst [vmem:[%s332_s1 + $0x8] sm:$0xff] %v218_v43 }
  0x15   :  { %221 = vst [vmem:[%s332_s1 + $0x10] sm:$0xff] %v220_v44  ;;  %v222_v45 = vld [vmem:[#allocation1 + $0x18] sm:$0xff]  ;;  %v224_v46 = vld [vmem:[#allocation1 + $0x20] sm:$0xff] }
  0x16   :  { %223 = vst [vmem:[%s332_s1 + $0x18] sm:$0xff] %v222_v45  ;;  %v226_v47 = vld [vmem:[#allocation1 + $0x28] sm:$0xff]  ;;  %225 = vst [vmem:[%s332_s1 + $0x20] sm:$0xff] %v224_v46 }
  0x17   :  { %227 = vst [vmem:[%s332_s1 + $0x28] sm:$0xff] %v226_v47  ;;  %v228_v48 = vld [vmem:[#allocation1 + $0x30] sm:$0xff]  ;;  %v230_v49 = vld [vmem:[#allocation1 + $0x38] sm:$0xff] }
  0x18   :  { %229 = vst [vmem:[%s332_s1 + $0x30] sm:$0xff] %v228_v48  ;;  %231 = vst [vmem:[%s332_s1 + $0x38] sm:$0xff] %v230_v49 }

// kernel: fourier_block_2d.3
= control target key start
LH: loop header
LB: loop body
LE: loop exit
PB: predicated region body
PF: predicated region fallthrough
CT: control target
= control target key end

     0   :  { %s551_s15 = smov 0   ;;  %s553_s16 = smov 0   ;;  %s624_s0 = inlined_call_operand.vmem [shape: f32[2,4,256], index: 0, kind: input, shape index: {}]   ;;  %s625_s1 = inlined_call_operand.vmem [shape: f32[2,4,256], index: 1, kind: input, shape index: {}]   ;;  %s626_s2 = inlined_call_operand.vmem [shape: f32[4,4], index: 2, kind: input, shape index: {}]   ;;  %s627_s3 = inlined_call_operand.vmem [shape: f32[4,1], index: 3, kind: input, shape index: {}]   ;;  %s628_s4 = inlined_call_operand.vmem [shape: f32[2,4,256], index: 4, kind: output, shape index: {}]  }
   0x1   :  { %s555_s17 = smov 0   ;;  %s557_s18 = smov 0  }
   0x2   :  { %s559_s19 = smov 0  }
   0x3 LB: > { %s23_s20 = sadd.s32 1, %s512_s17  ;;  %s26_s21 = sadd.s32 1, %s516_s18  ;;  %s520_s19 = sphi %s559_s19, %s14_s19   ;;  %s516_s18 = sphi %s557_s18, %s632_s18   ;;  %s512_s17 = sphi %s555_s17, %s631_s17   ;;  %s508_s16 = sphi %s553_s16, %s630_s16   ;;  %s504_s15 = sphi %s551_s15, %s629_s15  }
   0x4   : > { %p24_p0 = scmp.ge.s32.totalorder %s23_s20, 2  ;;  %p421_p1 = scmp.ge.s32.totalorder %s520_s19, 1 }
   0x5   : > { %p196_p2 = scmp.lt.s32.totalorder %s520_s19, 5 }
   0x6   : > { %s634_s20 = smov (%p24_p0, %s23_s20), 0  ;;  %s636_s21 = smov (!%p24_p0, %s26_s21), %s516_s18 }
   0x7   : > { %p197_p3 = pnand %p421_p1, %p196_p2  ;;  %p28_p4 = scmp.ge.s32.totalorder %s636_s21, 2 }
   0x8   : > { %p236_p5 = scmp.lt.s32.totalorder (!%p197_p3), %s508_s16, 1  ;;  %p238_p6 = scmp.lt.s32.totalorder (!%p197_p3), %s504_s15, 1 }
   0x9   : > { %s638_s21 = smov (%p28_p4, %s636_s21), 0  ;;  %200 = sbr.rel (%p197_p3) target bundleno = 170 (0xaa), region = 36 }
   0xe   : > { %v262_v0 = vld [vmem:[%s626_s2] sm:$0xf]  ;;  %v522_v1 = vmov 0   ;;  %v523_v2 = vmov 2   ;;  %v524_v3 = vmov 1   ;;  %v525_v4 = vmov 3  }
   0xf   : > { %474 = vset.pattern.permute.xlu0 %v522_v1  ;;  %476 = vset.pattern.permute.xlu1 %v523_v2  ;;  %v303_v5 = vld [vmem:[%s627_s3] sm:$0xf]  ;;  %s640_s16 = smov (!%p236_p5, %s508_s16), 1  ;;  %s642_s15 = smov (!%p238_p6, %s504_s15), 1  ;;  %v268_v6 = vlaneseq }
  0x10   : > { %265 = vperm.xlu0 %474, %v262_v0   ;;  %284 = vperm.xlu1 %476, %v262_v0   ;;  %s422_s26 = sshll.u32 %s640_s16, 1 }
  0x11   : > { %s241_s27 = sadd.s32 %s422_s26, %s642_s15  ;;  %v269_v7 = vshrl.u32 %v268_v6, 7 }
  0x12   : > { %s595_s28 = sshll.u32 %s241_s27, 2 }
  0x13   : > { %s251_s5 = scalar_lea.vmem %s625_s1, %s595_s28  ;;  %v270_v8 = vsub.s32 0, %v269_v7  ;;  %v279_v9 = vsub.s32 1, %v269_v7  ;;  %v289_v12 = vsub.s32 2, %v269_v7  ;;  %v299_v16 = vsub.s32 3, %v269_v7  ;;  %s243_s8 = scalar_lea.vmem %s624_s0, %s595_s28 }
  0x14   : > { %475 = vset.pattern.permute.xlu0 %v524_v3  ;;  %477 = vset.pattern.permute.xlu1 %v525_v4  ;;  %v261_v10 = vld [vmem:[%s251_s5] sm:$0xf]  ;;  %s259_s11 = scalar_lea.vmem %s628_s4, %s595_s28 }
  0x15   : > { %274 = vperm.xlu0 %475, %v262_v0   ;;  %294 = vperm.xlu1 %477, %v262_v0   ;;  %v271_v14 = vrot.slane %v261_v10, %v270_v8  ;;  %v280_v15 = vrot.slane %v261_v10, %v279_v9  ;;  %v290_v17 = vrot.slane %v261_v10, %v289_v12  ;;  %v260_v25 = vld [vmem:[%s243_s8] sm:$0xf] }
  0x16   : > { %v300_v22 = vrot.slane %v261_v10, %v299_v16 }
  0x19   : > { %478 = vset.pattern.permute.xlu1 %v522_v1  ;;  %479 = vset.pattern.permute.xlu0 %v522_v1 }
  0x1a   : > { %306 = vperm.xlu1 %478, %v303_v5  }
  0x8b   : > { %v266_v11 = vpop.permute.xlu0 %265  ;;  %v285_v13 = vpop.permute.xlu1 %284 }
  0x8c   : > { %v272_v20 = vmul.f32 %v271_v14, %v266_v11  ;;  %v291_v23 = vmul.f32 %v290_v17, %v285_v13 }
  0x90   : > { %v275_v18 = vpop.permute.xlu0 %274  ;;  %v295_v19 = vpop.permute.xlu1 %294 }
  0x91   : > { %v281_v21 = vmul.f32 %v280_v15, %v275_v18  ;;  %v301_v27 = vmul.f32 %v300_v22, %v295_v19 }
  0x93   : > { %v282_v24 = vadd.f32 %v281_v21, %v272_v20 }
  0x95   : > { %v292_v26 = vadd.f32 %v291_v23, %v282_v24  ;;  %v307_v28 = vpop.permute.xlu1 %306 }
  0x96   : > { %v309_v29 = vadd.f32 %v307_v28, %v260_v25 }
  0x97   : > { %v302_v30 = vadd.f32 %v301_v27, %v292_v26 }
  0x99   : > { %v310_v31 = vadd.f32 %v309_v29, %v302_v30 }
  0x9b   : > { %480 = vtanh.f32 %v310_v31 }
  0xa8   : > { %v481_v32 = vpop.eup %480 }
  0xa9   : > { %312 = vst [vmem:[%s259_s11] sm:$0xf] %v481_v32 }
  0xaa PF: > { %s14_s19 = sadd.s32 1, %s520_s19   ;;  %s629_s15 = smov %s512_s17 }
  0xab   : > { %p11_p7 = scmp.ge.s32.totalorder %s14_s19, 6   ;;  %s630_s16 = smov %s516_s18 }
  0xac   : > { %s631_s17 = smov %s634_s20  ;;  %s632_s18 = smov %s638_s21 }
  0xad   :  { %13 = sbr.rel (!%p11_p7) target bundleno = 3 (0x3), region = 69 }

</bundles_post_ra>
